<compile_context>
chip_gen: v7x
topology: tpu7x:2x2x1
jax: 0.10.0
libtpu: 0.0.40
codegen_flags: <defaults>
</compile_context>

<pallas_src>
import jax
import jax.numpy as jnp
from jax.experimental import pallas as pl
from jax.experimental.pallas import tpu as pltpu


def _round_up(x, m):
    return ((x + m - 1) // m) * m


# -----------------------------------------------------------------------------
# Path 1: degenerate Linear(1,1) — batch mapped onto the lane axis, pure VPU.
# -----------------------------------------------------------------------------
def _linear_1x1_kernel(w_ref, b_ref, x_ref, o_ref):
    # w_ref, b_ref: (1,1) f32 scalars in SMEM.  x_ref/o_ref: (tr, 128) blocks
    # whose elements ARE batch entries (lane-mapped batch -> full-width vst).
    y = x_ref[...].astype(jnp.float32) * w_ref[0, 0] + b_ref[0, 0]
    o_ref[...] = y.astype(o_ref.dtype)


def _linear_1x1(x, weight, bias):
    B = x.shape[0]
    LANES = 128
    rows = pl.cdiv(B, LANES)
    rows8 = _round_up(max(rows, 1), 8)          # sublane-aligned row count
    tr = min(1024, rows8)                       # rows per block (<= 512 KiB f32)
    b_pad = rows8 * LANES                       # overshoot <= ~1K elements

    x_flat = jnp.pad(x.reshape(-1), (0, b_pad - B)).reshape(rows8, LANES)
    w_s = weight.reshape(1, 1).astype(jnp.float32)
    b_s = bias.reshape(1, 1).astype(jnp.float32)

    out = pl.pallas_call(
        _linear_1x1_kernel,
        out_shape=jax.ShapeDtypeStruct((rows8, LANES), x.dtype),
        grid=(pl.cdiv(rows8, tr),),
        in_specs=[
            pl.BlockSpec(memory_space=pltpu.MemorySpace.SMEM),   # W scalar
            pl.BlockSpec(memory_space=pltpu.MemorySpace.SMEM),   # b scalar
            pl.BlockSpec((tr, LANES), lambda i: (i, 0)),
        ],
        out_specs=pl.BlockSpec((tr, LANES), lambda i: (i, 0)),
        compiler_params=pltpu.CompilerParams(
            dimension_semantics=("parallel",)),
    )(w_s, b_s, x_flat)
    return out.reshape(-1)[:B].reshape(B, 1)


# -----------------------------------------------------------------------------
# Path 2: tiny contraction (1 < K <= 16): VPU multiply-add, lane-dense output.
# -----------------------------------------------------------------------------
def _linear_small_k_kernel(x_ref, w_ref, b_ref, o_ref):
    # x_ref: (tb, K)   w_ref: (K, Np)   b_ref: (1, Np)   o_ref: (tb, Np)
    tb, n_pad = o_ref.shape
    k_dim = x_ref.shape[1]
    acc = jnp.broadcast_to(b_ref[...].astype(jnp.float32), (tb, n_pad))
    for k in range(k_dim):                                    # tiny K, unrolled
        acc = acc + (x_ref[:, k:k + 1].astype(jnp.float32)
                     * w_ref[k:k + 1, :].astype(jnp.float32))
    o_ref[...] = acc.astype(o_ref.dtype)


def _linear_small_k(x, weight, bias):
    B, K = x.shape
    N = weight.shape[0]
    n_pad = _round_up(N, 128)                 # lane-dense stores
    tb = min(1024, _round_up(B, 8))           # big sublane tile, no overshoot>7

    # Weight/bias are tiny on this path; the one-time (K, n_pad) rearrangement
    # is negligible.  No host-side batch padding: cdiv grid handles the edge.
    w_p = jnp.pad(weight.T, ((0, 0), (0, n_pad - N)))                 # (K, Np)
    bias_p = jnp.pad(bias.reshape(1, N), ((0, 0), (0, n_pad - N)))    # (1, Np)

    out = pl.pallas_call(
        _linear_small_k_kernel,
        out_shape=jax.ShapeDtypeStruct((B, n_pad), x.dtype),
        grid=(pl.cdiv(B, tb),),
        in_specs=[
            pl.BlockSpec((tb, K), lambda i: (i, 0)),
            pl.BlockSpec((K, n_pad), lambda i: (0, 0)),
            pl.BlockSpec((1, n_pad), lambda i: (0, 0)),
        ],
        out_specs=pl.BlockSpec((tb, n_pad), lambda i: (i, 0)),
        compiler_params=pltpu.CompilerParams(
            dimension_semantics=("parallel",)),
    )(x, w_p, bias_p)
    return out[:, :N]


# -----------------------------------------------------------------------------
# Path 3: tiled MXU matmul with K-reduction accumulator (bf16 in, f32 acc).
# -----------------------------------------------------------------------------
def _linear_tiled_kernel(x_ref, wt_ref, b_ref, o_ref, acc_ref):
    k = pl.program_id(2)

    @pl.when(k == 0)
    def _init():
        # Fold bias into the accumulator init: epilogue is a single cast+store.
        acc_ref[...] = jnp.broadcast_to(
            b_ref[...].astype(jnp.float32), acc_ref.shape)

    # Weight was transposed once on the host to (K, N): plain contraction,
    # no per-tile XLU transpose in the inner loop.
    acc_ref[...] += jnp.dot(x_ref[...], wt_ref[...],
                            preferred_element_type=jnp.float32)

    @pl.when(k == pl.num_programs(2) - 1)
    def _store():
        o_ref[...] = acc_ref[...].astype(o_ref.dtype)


def _linear_tiled(x, weight, bias, *, tm=256, tn=256, tk=512,
                  cast_bf16=True, out_dtype=None):
    B, K = x.shape
    N = weight.shape[0]
    out_dtype = out_dtype or x.dtype

    # Clamp tiles to the problem; keep (8,128) alignment.
    tm = min(tm, _round_up(B, 8))
    tn = min(tn, _round_up(N, 128))
    tk = min(tk, _round_up(K, 128))
    k_pad = _round_up(K, tk)                  # exact K tiling (reduction needs zeros)

    # Zero-pad ONLY along the contraction axis; B/N ragged edges are handled by
    # the cdiv grid (OOB rows/cols only ever feed masked output elements).
    x_p = x if k_pad == K else jnp.pad(x, ((0, 0), (0, k_pad - K)))
    w_kp = weight if k_pad == K else jnp.pad(weight, ((0, 0), (0, k_pad - K)))
    w_t = w_kp.T                              # one-time host transpose -> (K_pad, N)
    bias_2d = bias.reshape(1, N)
    if cast_bf16:
        # bf16 MXU inputs (v6e/v7x 256-wide bf16 MXU); f32 accumulate preserved.
        x_p = x_p.astype(jnp.bfloat16)
        w_t = w_t.astype(jnp.bfloat16)

    grid = (pl.cdiv(B, tm), pl.cdiv(N, tn), k_pad // tk)
    out = pl.pallas_call(
        _linear_tiled_kernel,
        out_shape=jax.ShapeDtypeStruct((B, N), out_dtype),
        grid=grid,
        in_specs=[
            pl.BlockSpec((tm, tk), lambda i, j, k: (i, k)),
            pl.BlockSpec((tk, tn), lambda i, j, k: (k, j)),
            pl.BlockSpec((1, tn), lambda i, j, k: (0, j)),
        ],
        out_specs=pl.BlockSpec((tm, tn), lambda i, j, k: (i, j)),
        scratch_shapes=[pltpu.VMEM((tm, tn), jnp.float32)],
        compiler_params=pltpu.CompilerParams(
            dimension_semantics=("parallel", "parallel", "arbitrary")),
    )(x_p, w_t, bias_2d)
    return out


def linear_forward(x, weight, bias, **tiled_kwargs):
    """PyTorch nn.Linear semantics: y = x @ weight.T + bias.

    x: (B, in_features), weight: (out_features, in_features), bias: (out_features,)
    """
    B, K = x.shape
    N = weight.shape[0]
    if K == 1 and N == 1:          # the literal Linear(1,1) of the module spec
        return _linear_1x1(x, weight, bias)
    if K <= 16:                    # contraction too shallow for the MXU
        return _linear_small_k(x, weight, bias)
    return _linear_tiled(x, weight, bias, **tiled_kwargs)


if __name__ == "__main__":
    key = jax.random.PRNGKey(0)
    k_w, k_b = jax.random.split(key)

    # nn.Linear(1, 1)-style deterministic init: uniform(-1/sqrt(in), 1/sqrt(in)).
    in_features, out_features = 1, 1
    bound = 1.0 / (in_features ** 0.5)
    weight = jax.random.uniform(
        k_w, (out_features, in_features), jnp.float32, -bound, bound)
    bias = jax.random.uniform(
        k_b, (out_features,), jnp.float32, -bound, bound)

    # 1) The literal spec: hour_var = tensor([[4.0]]).
    x = jnp.array([[4.0]], dtype=jnp.float32)
    y_pred = linear_forward(x, weight, bias)
    jax.block_until_ready(y_pred)
    y_ref = x @ weight.T + bias
    assert y_pred.shape == y_ref.shape, (y_pred.shape, y_ref.shape)
    assert jnp.allclose(y_pred, y_ref, atol=1e-6), (y_pred, y_ref)

    # 2) Lane-mapped degenerate path with a larger, non-aligned batch.
    xb = jax.random.normal(jax.random.PRNGKey(2), (259, 1), jnp.float32)
    yb = linear_forward(xb, weight, bias)
    jax.block_until_ready(yb)
    assert jnp.allclose(yb, xb @ weight.T + bias, atol=1e-5)

    # 3) Small-K VPU path (1 < K <= 16), ragged batch.
    kx3, kw3, kb3 = jax.random.split(jax.random.PRNGKey(3), 3)
    x3 = jax.random.normal(kx3, (10, 8), jnp.float32)
    w3 = jax.random.normal(kw3, (16, 8), jnp.float32)
    b3 = jax.random.normal(kb3, (16,), jnp.float32)
    y3 = linear_forward(x3, w3, b3)
    jax.block_until_ready(y3)
    assert jnp.allclose(y3, x3 @ w3.T + b3, atol=1e-4, rtol=1e-4)

    # 4) Tiled MXU path (bf16 inputs, f32 accumulate), non-tile-aligned shapes.
    kx4, kw4, kb4 = jax.random.split(jax.random.PRNGKey(1), 3)
    B4, K4, N4 = 48, 200, 136
    x4 = jax.random.normal(kx4, (B4, K4), jnp.float32)
    w4 = jax.random.normal(kw4, (N4, K4), jnp.float32) * 0.05
    b4 = jax.random.normal(kb4, (N4,), jnp.float32)
    y4 = linear_forward(x4, w4, b4)
    jax.block_until_ready(y4)
    # Reference with the same bf16 input quantization (f32 accumulation).
    y4_ref = (x4.astype(jnp.bfloat16).astype(jnp.float32)
              @ w4.astype(jnp.bfloat16).astype(jnp.float32).T) + b4
    assert jnp.allclose(y4, y4_ref, atol=1e-3, rtol=1e-3), \
        float(jnp.max(jnp.abs(y4 - y4_ref)))

    print("KERNEL_OK")
</pallas_src>

<mosaic_0001>
module attributes {stable_mosaic.version = 11 : i64} {
  func.func @_linear_1x1_kernel(%arg0: i32, %arg1: memref<1x1xf32, #tpu.memory_space<smem>>, %arg2: memref<1x1xf32, #tpu.memory_space<smem>>, %arg3: memref<8x128xf32, #tpu.memory_space<vmem>>, %arg4: memref<8x128xf32, #tpu.memory_space<vmem>>) attributes {dimension_semantics = [#tpu.dimension_semantics<parallel>], iteration_bounds = array<i64: 1>, scalar_prefetch = 0 : i64, scratch_operands = 0 : i64, tpu.core_type = #tpu.core_type<tc>, window_params = [{transform_indices = @transform_0, window_bounds = array<i64: 1, 1>}, {transform_indices = @transform_1, window_bounds = array<i64: 1, 1>}, {transform_indices = @transform_2, window_bounds = array<i64: 8, 128>}, {transform_indices = @transform_3, window_bounds = array<i64: 8, 128>}]} {
    %c0 = arith.constant 0 : index
    %c0_0 = arith.constant 0 : index
    %0 = vector.load %arg3[%c0, %c0_0] : memref<8x128xf32, #tpu.memory_space<vmem>>, vector<8x128xf32>
    %c0_1 = arith.constant 0 : index
    %c0_2 = arith.constant 0 : index
    %1 = memref.load %arg1[%c0_1, %c0_2] : memref<1x1xf32, #tpu.memory_space<smem>>
    %2 = vector.broadcast %1 : f32 to vector<8x128xf32>
    %3 = arith.mulf %0, %2 : vector<8x128xf32>
    %c0_3 = arith.constant 0 : index
    %c0_4 = arith.constant 0 : index
    %4 = memref.load %arg2[%c0_3, %c0_4] : memref<1x1xf32, #tpu.memory_space<smem>>
    %5 = vector.broadcast %4 : f32 to vector<8x128xf32>
    %6 = arith.addf %3, %5 : vector<8x128xf32>
    %c0_5 = arith.constant 0 : index
    %c0_6 = arith.constant 0 : index
    %7 = vector.load %arg4[%c0_5, %c0_6] : memref<8x128xf32, #tpu.memory_space<vmem>>, vector<8x128xf32>
    tpu.vector_store %arg4[%c0_5, %c0_6], %6 {strides = array<i32>} : memref<8x128xf32, #tpu.memory_space<vmem>>, vector<8x128xf32>,
    return
  }
  func.func @transform_0(%arg0: i32) -> (i32, i32) {
    %c0_i32 = arith.constant 0 : i32
    %c0_i32_0 = arith.constant 0 : i32
    %c0_i32_1 = arith.constant 0 : i32
    return %c0_i32, %c0_i32_0 : i32, i32
  }
  func.func @transform_1(%arg0: i32) -> (i32, i32) {
    %c0_i32 = arith.constant 0 : i32
    %c0_i32_0 = arith.constant 0 : i32
    %c0_i32_1 = arith.constant 0 : i32
    return %c0_i32, %c0_i32_0 : i32, i32
  }
  func.func @transform_2(%arg0: i32) -> (i32, i32) {
    %c0_i32 = arith.constant 0 : i32
    %c0_i32_0 = arith.constant 0 : i32
    return %arg0, %c0_i32 : i32, i32
  }
  func.func @transform_3(%arg0: i32) -> (i32, i32) {
    %c0_i32 = arith.constant 0 : i32
    %c0_i32_0 = arith.constant 0 : i32
    return %arg0, %c0_i32 : i32, i32
  }
}

</mosaic_0001>

<bundles_post_ra>
// kernel: tpu_custom_call.1
= control target key start
LH: loop header
LB: loop body
LE: loop exit
PB: predicated region body
PF: predicated region fallthrough
CT: control target
= control target key end

     0   :  { %10 = vsyncpa [#allocation5], 0  ;;  %s154_s0 = inlined_call_operand.<no memory space> [shape: f32[1,1], index: 0, kind: input, shape index: {}]   ;;  %s155_s1 = inlined_call_operand.<no memory space> [shape: f32[1,1], index: 1, kind: input, shape index: {}]   ;;  %s156_s2 = inlined_call_operand.hbm [shape: f32[8,128], index: 2, kind: input, shape index: {}]   ;;  %s157_s3 = inlined_call_operand.hbm [shape: f32[8,128], index: 3, kind: output, shape index: {}]  }
   0x1   :  { %11 = vsyncpa [#allocation6], 0  ;;  %s102_s12 = smov [#allocation4]   ;;  %s54_s16 = scalar_lea.hbm %s156_s2, 128 }
   0x2   :  { %s22_s13 = sshll.u32 %s102_s12, 4  ;;  %p55_p0 = scmp.ne.s32.totalorder %s156_s2, %s54_s16  ;;  %s23_s13 = int_to_ptr.vmem [resolvable:$true] %s22_s13 }
   0x3   :  { %p58_p1 = scmp.lt.u32.totalorder %s54_s16, %s156_s2 }
   0x5   :  { %p60_p2 = pnand %p58_p1, %p55_p0 }
   0x7   :  { %63 = shalt.err (!%p60_p2)
}
   0x8   :  { %s64_s21 = scalar_lea.vmem %s23_s13, 128  ;;  %p69_p4 = scmp.lt.s32.totalorder %s23_s13, %s23_s13 }
   0x9   :  { %p65_p3 = scmp.ne.s32.totalorder %s23_s13, %s64_s21  ;;  %p70_p5 = scmp.lt.s32.totalorder %s64_s21, %s64_s21 }
   0xb   :  { %p71_p6 = por %p70_p5, %p69_p4 }
   0xd   :  { %p72_p7 = pnand %p71_p6, %p65_p3 }
   0xf   :  { %75 = shalt.err (!%p72_p7)
}
  0x10   :  { %25 = dma.hbm_to_vmem [thread:$0]  %s156_s2, 128, %s23_s13, [#allocation5]  }
  0x11   :  { %98 = dma.done.wait [#allocation5], 128  }
  0x12   :  { %99 = vsyncadd [#allocation5], 4294967168  ;;  %v31_v0 = vstv %s154_s0  ;;  %v29_v1 = vld [vmem:[#allocation4] sm:$0xff]  ;;  %v34_v2 = vstv %s155_s1  ;;  %s103_s28 = smov [#allocation7]  }
  0x13   :  { %s43_s29 = sshll.u32 %s103_s28, 4  ;;  %v32_v3 = vmul.f32 %v31_v0, %v29_v1  ;;  %s44_s29 = int_to_ptr.vmem [resolvable:$true] %s43_s29 }
  0x14   :  { %s76_s30 = scalar_lea.vmem %s44_s29, 128  ;;  %p81_p9 = scmp.lt.s32.totalorder %s44_s29, %s44_s29 }
  0x15   :  { %v35_v4 = vadd.f32 %v34_v2, %v32_v3  ;;  %p77_p8 = scmp.ne.s32.totalorder %s44_s29, %s76_s30  ;;  %p82_p10 = scmp.lt.s32.totalorder %s76_s30, %s76_s30 }
  0x17   :  { %36 = vst [vmem:[#allocation7] sm:$0xff] %v35_v4  ;;  %p83_p11 = por %p82_p10, %p81_p9 }
  0x19   :  { %p84_p12 = pnand %p83_p11, %p77_p8 }
  0x1b   :  { %87 = shalt.err (!%p84_p12)
}
  0x1c   :  { %s88_s4 = scalar_lea.hbm %s157_s3, 128 }
  0x1d   :  { %p89_p13 = scmp.ne.s32.totalorder %s157_s3, %s88_s4  ;;  %p92_p0 = scmp.lt.u32.totalorder %s88_s4, %s157_s3 }
  0x1f   :  { %p94_p1 = pnand %p92_p0, %p89_p13 }
  0x21   :  { %97 = shalt.err (!%p94_p1)
}
  0x22   :  { %46 = dma.vmem_to_hbm [thread:$0]  %s44_s29, 128, %s157_s3, [#allocation6]  }
  0x23   :  { %100 = dma.done.wait [#allocation6], 128  }
  0x24   :  { %101 = vsyncadd [#allocation6], 4294967168 }
  0x25   :  { %50 = vsyncpa [#allocation5], 1 }
  0x26   :  { %51 = vsyncpa [#allocation6], 1 }

</bundles_post_ra>
